<compile_context>
chip_gen: v6e
topology: v6e:2x2x1
jax: 0.10.0
libtpu: 0.0.40
codegen_flags: <defaults>
</compile_context>

<pallas_src>
import functools

import jax
import jax.numpy as jnp
from jax.experimental import pallas as pl
from jax.experimental.pallas import tpu as pltpu


_LANE = 128          # TPU lane width
_SUBLANE = 8         # sublane granularity (second-to-last dim, f32/bf16 tiles)
_NEG_BIG = -1e30     # b4 lane-padding value -> padded logits vanish in the softmax


def _round_up(n, m):
    return ((n + m - 1) // m) * m


def _mlp_kernel(x_ref,
                w1_ref, b1_ref,
                w2_ref, b2_ref,
                w3_ref, b3_ref,
                w4_ref, b4_ref,
                o_ref, *, out_dim):
    """Fused fc1..fc4 + ReLU + log-softmax for one batch tile.

    x arrives in f32 (streamed straight from HBM) and is cast to the weights'
    compute dtype in-kernel; all matmuls accumulate in f32.  w4/b4 are
    lane-padded to a multiple of 128: padded weight columns are zero and padded
    bias entries are -1e30 (f32), so those lanes never affect the row max and
    contribute exp(~-1e30) == 0 to the sum -> the internal log-softmax math is
    lane-dense but mathematically over the true `out_dim` classes only.  The
    store is narrowed to the true classes, so the HBM writeback is 4 f32/row.
    """
    cdt = w1_ref.dtype
    x = x_ref[...].astype(cdt)

    h = jnp.dot(x, w1_ref[...], preferred_element_type=jnp.float32) + b1_ref[...]
    h = jnp.maximum(h, 0.0).astype(cdt)
    h = jnp.dot(h, w2_ref[...], preferred_element_type=jnp.float32) + b2_ref[...]
    h = jnp.maximum(h, 0.0).astype(cdt)
    h = jnp.dot(h, w3_ref[...], preferred_element_type=jnp.float32) + b3_ref[...]
    h = jnp.maximum(h, 0.0).astype(cdt)
    logits = jnp.dot(h, w4_ref[...],
                     preferred_element_type=jnp.float32) + b4_ref[...]

    # Numerically-stable log-softmax over the feature axis (padded lanes inert).
    m = jnp.max(logits, axis=-1, keepdims=True)
    shifted = logits - m
    lse = jnp.log(jnp.sum(jnp.exp(shifted), axis=-1, keepdims=True))
    # Narrow store: only the true classes go back to HBM.
    o_ref[...] = (shifted[:, :out_dim] - lse).astype(o_ref.dtype)


def _pick_batch_tile(B, input_dim, out_dim, target_tile, vmem_budget_bytes):
    """Pick (tile, num_tiles) minimizing padding under an explicit VMEM budget."""
    in_pad = _round_up(max(input_dim, 1), _LANE)
    out_pad = _round_up(max(out_dim, 1), _LANE)
    # Per-row VMEM bytes: double-buffered f32 x tile + double-buffered out tile
    # (lane-padded inside VMEM) + headroom for the live lane-padded f32/bf16
    # intermediates inside the body.  Weights are tiny and counted in the slack.
    bytes_per_row = 2 * 4 * in_pad + 2 * 4 * out_pad + 6 * 4 * _LANE
    cap = max(_SUBLANE,
              (vmem_budget_bytes // bytes_per_row) // _SUBLANE * _SUBLANE)
    tile = max(_SUBLANE, min(int(target_tile), cap, _round_up(B, _SUBLANE)))
    tile = _round_up(tile, _SUBLANE)
    num_tiles = pl.cdiv(B, tile)
    # v7x has 2 TensorCores: keep >= 2 grid programs whenever B allows it so
    # dimension_semantics=("parallel",) actually shards the grid.
    if num_tiles < 2 and B > _SUBLANE:
        num_tiles = 2
    # Re-split B as evenly as possible over the chosen number of grid steps so
    # batch padding stays below one sublane group (8 rows) per step.
    tile = _round_up(pl.cdiv(B, num_tiles), _SUBLANE)
    return tile, num_tiles


def ces_mia_classifier_forward(x, params, *, batch_tile=8192,
                               compute_dtype=jnp.bfloat16,
                               vmem_limit_bytes=32 * 1024 * 1024):
    """CesMiaClassifier forward pass via a single fused Pallas kernel.

    x:      [B, input_dim] float32
    params: dict with w1..w4 in [in, out] layout and b1..b4 as [1, out], float32.

    batch_tile is a *target*; the actual tile is clamped by an explicit VMEM
    budget (3/4 of vmem_limit_bytes) and re-derived from B to minimize padding.
    Contract: inputs/weights are streamed in bf16, so outputs match the f32
    PyTorch model to ~1e-1 (f32 accumulation keeps the softmax stable).
    """
    B, input_dim = x.shape
    out_dim = params["w4"].shape[1]
    out_pad = _round_up(out_dim, _LANE)

    vmem_budget = (vmem_limit_bytes * 3) // 4
    tile, num_tiles = _pick_batch_tile(B, input_dim, out_dim, batch_tile,
                                       vmem_budget)
    b_pad = tile * num_tiles
    grid = (num_tiles,)

    # x streams as f32 straight from HBM (no wrapper-side cast pre-pass); only
    # pad when the batch is not already a tile multiple.
    x_in = x if b_pad == B else jnp.pad(x, ((0, b_pad - B), (0, 0)))

    w1 = params["w1"].astype(compute_dtype)
    w2 = params["w2"].astype(compute_dtype)
    w3 = params["w3"].astype(compute_dtype)
    w4 = params["w4"].astype(compute_dtype)
    # Biases stay f32 (added onto the f32 accumulator).  NOTE: the -1e30 lane
    # padding of b4 relies on b4 staying f32 -- do not cast it to bf16.
    b1 = params["b1"].astype(jnp.float32)
    b2 = params["b2"].astype(jnp.float32)
    b3 = params["b3"].astype(jnp.float32)
    b4 = params["b4"].astype(jnp.float32)
    if out_pad != out_dim:
        w4 = jnp.pad(w4, ((0, 0), (0, out_pad - out_dim)))
        b4 = jnp.pad(b4, ((0, 0), (0, out_pad - out_dim)),
                     constant_values=_NEG_BIG)

    # Whole-array blocks for parameters: constant index_map -> fetched once,
    # resident in VMEM across all grid steps.
    def weight_spec(arr):
        return pl.BlockSpec(arr.shape, lambda i: (0, 0))

    in_specs = [
        pl.BlockSpec((tile, input_dim), lambda i: (i, 0)),  # streamed f32 x tile
        weight_spec(w1), weight_spec(b1),
        weight_spec(w2), weight_spec(b2),
        weight_spec(w3), weight_spec(b3),
        weight_spec(w4), weight_spec(b4),
    ]
    # Narrow, contiguous output: block last dim equals the full array dim, so
    # only out_dim f32 per row are written back (no padded slab, no wrapper
    # slice of a wide slab afterwards).
    out_spec = pl.BlockSpec((tile, out_dim), lambda i: (i, 0))

    fn = pl.pallas_call(
        functools.partial(_mlp_kernel, out_dim=out_dim),
        out_shape=jax.ShapeDtypeStruct((b_pad, out_dim), jnp.float32),
        grid_spec=pltpu.PrefetchScalarGridSpec(
            num_scalar_prefetch=0,
            grid=grid,
            in_specs=in_specs,
            out_specs=out_spec,
        ),
        compiler_params=pltpu.CompilerParams(
            dimension_semantics=("parallel",),
            vmem_limit_bytes=vmem_limit_bytes,
        ),
    )
    out = fn(x_in, w1, b1, w2, b2, w3, b3, w4, b4)
    # Drop batch padding only when it exists (no lane slicing needed anymore).
    return out if b_pad == B else out[:B]


def init_params(key, input_dim, h1, h2, h3, output_dim):
    """Deterministic synthetic parameters (PyTorch-Linear-like uniform init),
    stored already transposed to [in, out]."""
    dims = [(input_dim, h1), (h1, h2), (h2, h3), (h3, output_dim)]
    params = {}
    for idx, (fan_in, fan_out) in enumerate(dims, start=1):
        key, kw, kb = jax.random.split(key, 3)
        bound = 1.0 / jnp.sqrt(jnp.float32(fan_in))
        params[f"w{idx}"] = jax.random.uniform(
            kw, (fan_in, fan_out), jnp.float32, minval=-bound, maxval=bound)
        params[f"b{idx}"] = jax.random.uniform(
            kb, (1, fan_out), jnp.float32, minval=-bound, maxval=bound)
    return params


def _reference_forward_mixed(x, params, compute_dtype=jnp.bfloat16):
    """Pure-JAX reference mirroring the kernel's precision (bf16 in, f32 acc)."""
    def lin(h, w, b):
        return jnp.dot(h.astype(compute_dtype), w.astype(compute_dtype),
                       preferred_element_type=jnp.float32) + b
    h = jnp.maximum(lin(x, params["w1"], params["b1"]), 0.0)
    h = jnp.maximum(lin(h, params["w2"], params["b2"]), 0.0)
    h = jnp.maximum(lin(h, params["w3"], params["b3"]), 0.0)
    logits = lin(h, params["w4"], params["b4"])
    m = jnp.max(logits, axis=-1, keepdims=True)
    return (logits - m) - jnp.log(
        jnp.sum(jnp.exp(logits - m), axis=-1, keepdims=True))


def _reference_forward_f32(x, params):
    h = jnp.maximum(x @ params["w1"] + params["b1"], 0.0)
    h = jnp.maximum(h @ params["w2"] + params["b2"], 0.0)
    h = jnp.maximum(h @ params["w3"] + params["b3"], 0.0)
    logits = h @ params["w4"] + params["b4"]
    return jax.nn.log_softmax(logits, axis=1)


if __name__ == "__main__":
    # Small shapes consistent with the module: x is [batch, input_dim].
    batch, input_dim = 50, 32
    h1, h2, h3, output_dim = 64, 32, 16, 4

    key = jax.random.PRNGKey(0)
    key, kx = jax.random.split(key)
    x = jax.random.normal(kx, (batch, input_dim), jnp.float32)
    params = init_params(key, input_dim, h1, h2, h3, output_dim)

    # Explicit small target tile -> multi-program grid; exercises batch padding
    # (50 -> 64) and the narrow (out_dim-wide) output store path.
    out = ces_mia_classifier_forward(x, params, batch_tile=16)
    out = jax.block_until_ready(out)
    assert out.shape == (batch, output_dim)

    ref = _reference_forward_mixed(x, params)
    assert jnp.allclose(out, ref, atol=5e-4, rtol=5e-4), \
        "mismatch vs mixed-precision reference"

    # Sanity check against the pure-f32 PyTorch-equivalent math (loose tolerance
    # because inputs/weights are streamed in bf16).
    ref32 = _reference_forward_f32(x, params)
    assert jnp.allclose(out, ref32, atol=0.1), "mismatch vs f32 reference"

    # Default (large) target tile path: tile picker clamps to B, keeps >=2
    # grid programs, minimal padding.
    out2 = jax.block_until_ready(ces_mia_classifier_forward(x, params))
    assert out2.shape == (batch, output_dim)
    assert jnp.allclose(out2, ref, atol=5e-4, rtol=5e-4)

    print("KERNEL_OK")
</pallas_src>

<mosaic_0001>
module attributes {stable_mosaic.version = 11 : i64} {
  func.func @_mlp_kernel(%arg0: i32, %arg1: memref<16x32xf32, #tpu.memory_space<vmem>>, %arg2: memref<32x64xbf16, #tpu.memory_space<vmem>>, %arg3: memref<1x64xf32, #tpu.memory_space<vmem>>, %arg4: memref<64x32xbf16, #tpu.memory_space<vmem>>, %arg5: memref<1x32xf32, #tpu.memory_space<vmem>>, %arg6: memref<32x16xbf16, #tpu.memory_space<vmem>>, %arg7: memref<1x16xf32, #tpu.memory_space<vmem>>, %arg8: memref<16x128xbf16, #tpu.memory_space<vmem>>, %arg9: memref<1x128xf32, #tpu.memory_space<vmem>>, %arg10: memref<16x4xf32, #tpu.memory_space<vmem>>) attributes {dimension_semantics = [#tpu.dimension_semantics<parallel>], iteration_bounds = array<i64: 4>, scalar_prefetch = 0 : i64, scratch_operands = 0 : i64, tpu.core_type = #tpu.core_type<tc>, window_params = [{transform_indices = @transform_0, window_bounds = array<i64: 16, 32>}, {pipeline_mode = #tpu.pipeline_mode<synchronous>, transform_indices = @transform_1, window_bounds = array<i64: 32, 64>}, {pipeline_mode = #tpu.pipeline_mode<synchronous>, transform_indices = @transform_2, window_bounds = array<i64: 1, 64>}, {pipeline_mode = #tpu.pipeline_mode<synchronous>, transform_indices = @transform_3, window_bounds = array<i64: 64, 32>}, {pipeline_mode = #tpu.pipeline_mode<synchronous>, transform_indices = @transform_4, window_bounds = array<i64: 1, 32>}, {pipeline_mode = #tpu.pipeline_mode<synchronous>, transform_indices = @transform_5, window_bounds = array<i64: 32, 16>}, {pipeline_mode = #tpu.pipeline_mode<synchronous>, transform_indices = @transform_6, window_bounds = array<i64: 1, 16>}, {pipeline_mode = #tpu.pipeline_mode<synchronous>, transform_indices = @transform_7, window_bounds = array<i64: 16, 128>}, {pipeline_mode = #tpu.pipeline_mode<synchronous>, transform_indices = @transform_8, window_bounds = array<i64: 1, 128>}, {transform_indices = @transform_9, window_bounds = array<i64: 16, 4>}]} {
    %c0 = arith.constant 0 : index
    %c0_0 = arith.constant 0 : index
    %0 = vector.load %arg1[%c0, %c0_0] : memref<16x32xf32, #tpu.memory_space<vmem>>, vector<16x32xf32>
    %1 = arith.truncf %0 : vector<16x32xf32> to vector<16x32xbf16>
    %c0_1 = arith.constant 0 : index
    %c0_2 = arith.constant 0 : index
    %2 = vector.load %arg2[%c0_1, %c0_2] : memref<32x64xbf16, #tpu.memory_space<vmem>>, vector<32x64xbf16>
    %cst = arith.constant dense<0.000000e+00> : vector<16x64xf32>
    %3 = tpu.matmul %1, %2, %cst {dimension_numbers = #tpu.dot_dimension_numbers<[1], [0], [0], [1], [0, 0, 1, 1], [], []>} : vector<16x32xbf16>, vector<32x64xbf16>, vector<16x64xf32> -> vector<16x64xf32>
    %c0_3 = arith.constant 0 : index
    %c0_4 = arith.constant 0 : index
    %4 = vector.load %arg3[%c0_3, %c0_4] : memref<1x64xf32, #tpu.memory_space<vmem>>, vector<1x64xf32>
    %5 = vector.broadcast %4 : vector<1x64xf32> to vector<16x64xf32>
    %6 = arith.addf %3, %5 : vector<16x64xf32>
    %cst_5 = arith.constant 0.000000e+00 : f32
    %7 = vector.broadcast %cst_5 : f32 to vector<16x64xf32>
    %8 = arith.maximumf %6, %7 : vector<16x64xf32>
    %9 = arith.truncf %8 : vector<16x64xf32> to vector<16x64xbf16>
    %c0_6 = arith.constant 0 : index
    %c0_7 = arith.constant 0 : index
    %10 = vector.load %arg4[%c0_6, %c0_7] : memref<64x32xbf16, #tpu.memory_space<vmem>>, vector<64x32xbf16>
    %cst_8 = arith.constant dense<0.000000e+00> : vector<16x32xf32>
    %11 = tpu.matmul %9, %10, %cst_8 {dimension_numbers = #tpu.dot_dimension_numbers<[1], [0], [0], [1], [0, 0, 1, 1], [], []>} : vector<16x64xbf16>, vector<64x32xbf16>, vector<16x32xf32> -> vector<16x32xf32>
    %c0_9 = arith.constant 0 : index
    %c0_10 = arith.constant 0 : index
    %12 = vector.load %arg5[%c0_9, %c0_10] : memref<1x32xf32, #tpu.memory_space<vmem>>, vector<1x32xf32>
    %13 = vector.broadcast %12 : vector<1x32xf32> to vector<16x32xf32>
    %14 = arith.addf %11, %13 : vector<16x32xf32>
    %cst_11 = arith.constant 0.000000e+00 : f32
    %15 = vector.broadcast %cst_11 : f32 to vector<16x32xf32>
    %16 = arith.maximumf %14, %15 : vector<16x32xf32>
    %17 = arith.truncf %16 : vector<16x32xf32> to vector<16x32xbf16>
    %c0_12 = arith.constant 0 : index
    %c0_13 = arith.constant 0 : index
    %18 = vector.load %arg6[%c0_12, %c0_13] : memref<32x16xbf16, #tpu.memory_space<vmem>>, vector<32x16xbf16>
    %cst_14 = arith.constant dense<0.000000e+00> : vector<16x16xf32>
    %19 = tpu.matmul %17, %18, %cst_14 {dimension_numbers = #tpu.dot_dimension_numbers<[1], [0], [0], [1], [0, 0, 1, 1], [], []>} : vector<16x32xbf16>, vector<32x16xbf16>, vector<16x16xf32> -> vector<16x16xf32>
    %c0_15 = arith.constant 0 : index
    %c0_16 = arith.constant 0 : index
    %20 = vector.load %arg7[%c0_15, %c0_16] : memref<1x16xf32, #tpu.memory_space<vmem>>, vector<1x16xf32>
    %21 = vector.broadcast %20 : vector<1x16xf32> to vector<16x16xf32>
    %22 = arith.addf %19, %21 : vector<16x16xf32>
    %cst_17 = arith.constant 0.000000e+00 : f32
    %23 = vector.broadcast %cst_17 : f32 to vector<16x16xf32>
    %24 = arith.maximumf %22, %23 : vector<16x16xf32>
    %25 = arith.truncf %24 : vector<16x16xf32> to vector<16x16xbf16>
    %c0_18 = arith.constant 0 : index
    %c0_19 = arith.constant 0 : index
    %26 = vector.load %arg8[%c0_18, %c0_19] : memref<16x128xbf16, #tpu.memory_space<vmem>>, vector<16x128xbf16>
    %cst_20 = arith.constant dense<0.000000e+00> : vector<16x128xf32>
    %27 = tpu.matmul %25, %26, %cst_20 {dimension_numbers = #tpu.dot_dimension_numbers<[1], [0], [0], [1], [0, 0, 1, 1], [], []>} : vector<16x16xbf16>, vector<16x128xbf16>, vector<16x128xf32> -> vector<16x128xf32>
    %c0_21 = arith.constant 0 : index
    %c0_22 = arith.constant 0 : index
    %28 = vector.load %arg9[%c0_21, %c0_22] : memref<1x128xf32, #tpu.memory_space<vmem>>, vector<1x128xf32>
    %29 = vector.broadcast %28 : vector<1x128xf32> to vector<16x128xf32>
    %30 = arith.addf %27, %29 : vector<16x128xf32>
    %cst_23 = arith.constant dense<0xFF800000> : vector<16xf32>
    %31 = vector.multi_reduction <maximumf>, %30, %cst_23 [1] : vector<16x128xf32> to vector<16xf32>
    %32 = vector.shape_cast %31 : vector<16xf32> to vector<16x1xf32>
    %33 = vector.broadcast %32 : vector<16x1xf32> to vector<16x128xf32>
    %34 = arith.subf %30, %33 : vector<16x128xf32>
    %35 = math.exp %34 : vector<16x128xf32>
    %cst_24 = arith.constant dense<0.000000e+00> : vector<16xf32>
    %36 = vector.multi_reduction <add>, %35, %cst_24 [1] : vector<16x128xf32> to vector<16xf32>
    %37 = vector.shape_cast %36 : vector<16xf32> to vector<16x1xf32>
    %38 = math.log %37 : vector<16x1xf32>
    %39 = vector.extract_strided_slice %34 {offsets = [0, 0], sizes = [16, 4], strides = [1, 1]} : vector<16x128xf32> to vector<16x4xf32>
    %40 = vector.broadcast %38 : vector<16x1xf32> to vector<16x4xf32>
    %41 = arith.subf %39, %40 : vector<16x4xf32>
    %c0_25 = arith.constant 0 : index
    %c0_26 = arith.constant 0 : index
    %42 = vector.load %arg10[%c0_25, %c0_26] : memref<16x4xf32, #tpu.memory_space<vmem>>, vector<16x4xf32>
    tpu.vector_store %arg10[%c0_25, %c0_26], %41 {strides = array<i32>} : memref<16x4xf32, #tpu.memory_space<vmem>>, vector<16x4xf32>,
    return
  }
  func.func @transform_0(%arg0: i32) -> (i32, i32) {
    %c0_i32 = arith.constant 0 : i32
    %c0_i32_0 = arith.constant 0 : i32
    return %arg0, %c0_i32 : i32, i32
  }
  func.func @transform_1(%arg0: i32) -> (i32, i32) {
    %c0_i32 = arith.constant 0 : i32
    %c0_i32_0 = arith.constant 0 : i32
    %c0_i32_1 = arith.constant 0 : i32
    return %c0_i32, %c0_i32_0 : i32, i32
  }
  func.func @transform_2(%arg0: i32) -> (i32, i32) {
    %c0_i32 = arith.constant 0 : i32
    %c0_i32_0 = arith.constant 0 : i32
    %c0_i32_1 = arith.constant 0 : i32
    return %c0_i32, %c0_i32_0 : i32, i32
  }
  func.func @transform_3(%arg0: i32) -> (i32, i32) {
    %c0_i32 = arith.constant 0 : i32
    %c0_i32_0 = arith.constant 0 : i32
    %c0_i32_1 = arith.constant 0 : i32
    return %c0_i32, %c0_i32_0 : i32, i32
  }
  func.func @transform_4(%arg0: i32) -> (i32, i32) {
    %c0_i32 = arith.constant 0 : i32
    %c0_i32_0 = arith.constant 0 : i32
    %c0_i32_1 = arith.constant 0 : i32
    return %c0_i32, %c0_i32_0 : i32, i32
  }
  func.func @transform_5(%arg0: i32) -> (i32, i32) {
    %c0_i32 = arith.constant 0 : i32
    %c0_i32_0 = arith.constant 0 : i32
    %c0_i32_1 = arith.constant 0 : i32
    return %c0_i32, %c0_i32_0 : i32, i32
  }
  func.func @transform_6(%arg0: i32) -> (i32, i32) {
    %c0_i32 = arith.constant 0 : i32
    %c0_i32_0 = arith.constant 0 : i32
    %c0_i32_1 = arith.constant 0 : i32
    return %c0_i32, %c0_i32_0 : i32, i32
  }
  func.func @transform_7(%arg0: i32) -> (i32, i32) {
    %c0_i32 = arith.constant 0 : i32
    %c0_i32_0 = arith.constant 0 : i32
    %c0_i32_1 = arith.constant 0 : i32
    return %c0_i32, %c0_i32_0 : i32, i32
  }
  func.func @transform_8(%arg0: i32) -> (i32, i32) {
    %c0_i32 = arith.constant 0 : i32
    %c0_i32_0 = arith.constant 0 : i32
    %c0_i32_1 = arith.constant 0 : i32
    return %c0_i32, %c0_i32_0 : i32, i32
  }
  func.func @transform_9(%arg0: i32) -> (i32, i32) {
    %c0_i32 = arith.constant 0 : i32
    %c0_i32_0 = arith.constant 0 : i32
    return %arg0, %c0_i32 : i32, i32
  }
}

</mosaic_0001>

<bundles_post_ra>
// kernel: tpu_custom_call.1
= control target key start
LH: loop header
LB: loop body
LE: loop exit
PB: predicated region body
PF: predicated region fallthrough
CT: control target
= control target key end

     0   :  { %s869_s30 = smov 0   ;;  %s938_s0 = inlined_call_operand.vmem [shape: f32[64,32], index: 0, kind: input, shape index: {}]   ;;  %s939_s1 = inlined_call_operand.vmem [shape: bf16[32,64], index: 1, kind: input, shape index: {}]   ;;  %s940_s2 = inlined_call_operand.vmem [shape: f32[1,64], index: 2, kind: input, shape index: {}]   ;;  %s941_s3 = inlined_call_operand.vmem [shape: bf16[64,32], index: 3, kind: input, shape index: {}]   ;;  %s942_s4 = inlined_call_operand.vmem [shape: f32[1,32], index: 4, kind: input, shape index: {}]   ;;  %s943_s5 = inlined_call_operand.vmem [shape: bf16[32,16], index: 5, kind: input, shape index: {}]   ;;  %s944_s6 = inlined_call_operand.vmem [shape: f32[1,16], index: 6, kind: input, shape index: {}]   ;;  %s945_s7 = inlined_call_operand.vmem [shape: bf16[16,128], index: 7, kind: input, shape index: {}]   ;;  %s946_s8 = inlined_call_operand.vmem [shape: f32[1,128], index: 8, kind: input, shape index: {}]   ;;  %s947_s9 = inlined_call_operand.vmem [shape: f32[64,4], index: 9, kind: output, shape index: {}]  }
   0x1 LB: > { %s707_s10 = sadd.s32 4294967295, %s815_s30   ;;  %p711_p0 = scmp.ge.s32.totalorder %s815_s30, 1  ;;  %s815_s30 = sphi %s869_s30, %s19_s30  }
   0x2   : > { %p288_p1 = scmp.lt.s32.totalorder %s815_s30, 5 }
   0x4   : > { %p289_p2 = pnand %p711_p0, %p288_p1 }
   0x5   : > { %s712_s15 = sshll.u32 (!%p289_p2), %s707_s10, 1 }
   0x6   : > { %292 = sbr.rel (%p289_p2) target bundleno = 1141 (0x475), region = 56  ;;  %p325_p3 = scmp.lt.s32.totalorder (!%p289_p2), %s712_s15, 7 }
   0xb   : > { %v792_v0 = vld [vmem:[%s939_s1 + $0x8] sm:$0xff]   ;;  %v817_v1 = vmov 0.0   ;;  %v793_v2 = vld [vmem:[%s939_s1] sm:$0xff]   ;;  %vm818_vm0 = vmmov 0   ;;  %v794_v3 = vld [vmem:[%s941_s3 + $0x18] sm:$0xff]   ;;  %s949_s15 = smov (!%p325_p3, %s712_s15), 7 }
   0xc   : > { %748 = vmatprep.subr.bf16.mxu0 %v817_v1  ;;  %756 = vmatprep.subr.bf16.mxu1 %v817_v1  ;;  %s713_s18 = sshll.u32 %s949_s15, 3  ;;  %vm363_vm1 = vcmask 261120   ;;  %v795_v7 = vld [vmem:[%s941_s3 + $0x10] sm:$0xff]   ;;  %v796_v8 = vld [vmem:[%s941_s3 + $0x8] sm:$0xff]   ;;  %v797_v9 = vld [vmem:[%s941_s3] sm:$0xff]   ;;  %vm450_vm2 = vcmask 523264  }
   0xd   : > { %749 = vmatpush3.bf16.msra.mxu0 %v792_v0  ;;  %752 = vmatprep.mubr.msk.bf16.mxu0 %vm818_vm0, %v817_v1  ;;  %s328_s21 = scalar_lea.vmem %s938_s0, %s713_s18  ;;  %v716_v10 = vld [vmem:[%s940_s2] ss:$0 sm:$0xff]  ;;  %v798_v20 = vld [vmem:[%s943_s5 + $0x8] sm:$0xff]   ;;  %vm583_vm3 = vcmask 130048   ;;  %s334_s26 = scalar_lea.vmem %s947_s9, %s713_s18  ;;  %vm648_vm4 = vcmask 31744  }
   0xe   : > { %750 = vmatprep.subr.bf16.mxu0 %v817_v1  ;;  %764 = vmatprep.mubr.msk.bf16.mxu1 %vm818_vm0, %v817_v1  ;;  %v337_v4 = vld [vmem:[%s328_s21] sm:$0xff]  ;;  %v338_v5 = vld [vmem:[%s328_s21 + $0x8] sm:$0xff] }
   0xf   : > { %757 = vmatpush3.bf16.msra.mxu1 %v794_v3  ;;  %v339_v6 = vpack.c.bf16 %v338_v5, %v337_v4  ;;  %v799_v21 = vld [vmem:[%s943_s5] sm:$0xff]  }
  0x10   : > { %758 = vmatprep.subr.bf16.mxu1 %v817_v1  ;;  %v720_v22 = vld [vmem:[%s942_s4] ss:$0 sm:$0xff] }
  0x11   : > { %751 = vmatpush3.bf16.msra.mxu0 %v793_v2  ;;  %v800_v32 = vld [vmem:[%s945_s7] sm:$0xff]  }
  0x12   : > { %768 = vmatprep.subr.bf16.mxu0 %v817_v1  ;;  %v726_v33 = vld [vmem:[%s944_s6] ss:$0 sm:$0xff] }
  0x13   : > { %759 = vmatpush3.bf16.msra.mxu1 %v795_v7  ;;  %v730_v43 = vld [vmem:[%s946_s8] ss:$0 sm:$0xff] }
  0x14   : > { %753 = vmatmul.mubr.msk.bf16.vlgmr.msra.gmra.mxu0 %vm363_vm1, %v339_v6  ;;  %760 = vmatprep.subr.bf16.mxu1 %v817_v1 }
  0x15   : > { %772 = vmatprep.mubr.msk.bf16.mxu0 %vm818_vm0, %v817_v1  ;;  %769 = vmatpush3.bf16.msra.mxu0 %v798_v20 }
  0x16   : > { %770 = vmatprep.subr.bf16.mxu0 %v817_v1 }
  0x17   : > { %761 = vmatpush3.bf16.msra.mxu1 %v796_v8 }
  0x18   : > { %762 = vmatprep.subr.bf16.mxu1 %v817_v1 }
  0x19   : > { %771 = vmatpush3.bf16.msra.mxu0 %v799_v21 }
  0x1a   : > { %776 = vmatprep.subr.bf16.mxu0 %v817_v1 }
  0x1b   : > { %763 = vmatpush3.bf16.msra.mxu1 %v797_v9 }
  0xd4   : > { %v401_v11 = vpop.f32.mrf.mxu0 }
  0xd5   : > { %v402_v13 = vadd.f32 %v716_v10, %v401_v11 }
  0xd6   : > { %v754_v12 = vpop.f32.mrf.mxu0 }
  0xd7   : > { %v408_v17 = vmax.f32 %v402_v13, 0.0 }
  0xd8   : > { %v404_v14 = vpop.f32.mrf.mxu0 }
  0xd9   : > { %v405_v15 = vadd.f32 %v716_v10, %v404_v14 }
  0xda   : > { %v755_v16 = vpop.f32.mrf.mxu0 }
  0xdb   : > { %v409_v18 = vmax.f32 %v405_v15, 0.0 }
  0xdd   : > { %v410_v19 = vpack.c.bf16 %v409_v18, %v408_v17 }
  0xdf   : > { %765 = vmatmul.mubr.msk.bf16.vlgmr.msra.gmra.mxu1 %vm450_vm2, %v410_v19 }
 0x19f   : > { %v488_v23 = vpop.f32.mrf.mxu1 }
 0x1a0   : > { %v489_v25 = vadd.f32 %v720_v22, %v488_v23 }
 0x1a1   : > { %v766_v24 = vpop.f32.mrf.mxu1 }
 0x1a2   : > { %v495_v29 = vmax.f32 %v489_v25, 0.0 }
 0x1a3   : > { %v491_v26 = vpop.f32.mrf.mxu1 }
 0x1a4   : > { %v492_v27 = vadd.f32 %v720_v22, %v491_v26 }
 0x1a5   : > { %v767_v28 = vpop.f32.mrf.mxu1 }
 0x1a6   : > { %v496_v30 = vmax.f32 %v492_v27, 0.0 }
 0x1a8   : > { %v497_v31 = vpack.c.bf16 %v496_v30, %v495_v29 }
 0x1aa   : > { %773 = vmatmul.mubr.msk.bf16.vlgmr.msra.gmra.mxu0 %vm363_vm1, %v497_v31 }
 0x1ab   : > { %778 = vmatprep.mubr.msk.bf16.mxu0 %vm818_vm0, %v817_v1  ;;  %777 = vmatpush3.bf16.msra.mxu0 %v800_v32 }
 0x26a   : > { %v558_v34 = vpop.f32.mrf.mxu0 }
 0x26b   : > { %v559_v36 = vadd.f32 %v726_v33, %v558_v34 }
 0x26c   : > { %v774_v35 = vpop.f32.mrf.mxu0 }
 0x26d   : > { %v565_v40 = vmax.f32 %v559_v36, 0.0 }
 0x26e   : > { %v561_v37 = vpop.f32.mrf.mxu0 }
 0x26f   : > { %v562_v38 = vadd.f32 %v726_v33, %v561_v37 }
 0x270   : > { %v775_v39 = vpop.f32.mrf.mxu0 }
 0x271   : > { %v566_v41 = vmax.f32 %v562_v38, 0.0 }
 0x273   : > { %v567_v42 = vpack.c.bf16 %v566_v41, %v565_v40 }
 0x275   : > { %779 = vmatmul.mubr.msk.bf16.vlgmr.msra.gmra.mxu0 %vm583_vm3, %v567_v42 }
 0x335   : > { %v621_v44 = vpop.f32.mrf.mxu0 }
 0x336   : > { %v622_v45 = vadd.f32 %v730_v43, %v621_v44 }
 0x337   : > { %v780_v46 = vpop.f32.mrf.mxu0 }
 0x338   : > { %628 = vmax.xlane.f32.xlu0 %v622_v45 }
 0x339   : > { %v624_v47 = vpop.f32.mrf.mxu0 }
 0x33a   : > { %v625_v48 = vadd.f32 %v730_v43, %v624_v47 }
 0x33b   : > { %v781_v49 = vpop.f32.mrf.mxu0 }
 0x33c   : > { %630 = vmax.xlane.f32.xlu0 %v625_v48 }
 0x3c1   : > { %v629_v50 = vpop.xlane.xlu0 %628 }
 0x3c2   : > { %v632_v51 = vsub.f32 %v622_v45, %v629_v50 }
 0x3c4   : > { %v634_v52 = vmul.f32 1.442695, %v632_v51 }
 0x3c5   : > { %v631_v53 = vpop.xlane.xlu0 %630 }
 0x3c6   : > { %v633_v54 = vsub.f32 %v625_v48, %v631_v53  ;;  %801 = vpow2.f32 %v634_v52 }
 0x3c8   : > { %v636_v55 = vmul.f32 1.442695, %v633_v54 }
 0x3ca   : > { %803 = vpow2.f32 %v636_v55 }
 0x3d3   : > { %v802_v56 = vpop.eup %801 }
 0x3d4   : > { %638 = vadd.xlane.f32.xlu1 %v802_v56 }
 0x3d7   : > { %v804_v57 = vpop.eup %803 }
 0x3d8   : > { %640 = vadd.xlane.f32.xlu1 %v804_v57 }
 0x45d   : > { %v639_v58 = vpop.xlane.xlu1 %638 }
 0x45e   : > { %805 = vlog2.f32 %v639_v58 }
 0x461   : > { %v641_v59 = vpop.xlane.xlu1 %640 }
 0x462   : > { %807 = vlog2.f32 %v641_v59 }
 0x46b   : > { %v806_v60 = vpop.eup %805 }
 0x46c   : > { %v643_v61 = vmul.f32 0.6931472, %v806_v60 }
 0x46e   : > { %v646_v62 = vsub.f32 %v632_v51, %v643_v61 }
 0x46f   : > { %v808_v63 = vpop.eup %807 }
 0x470   : > { %649 = vst.msk [vmem:[%s334_s26] sm:$0xff] %vm648_vm4, %v646_v62  ;;  %v645_v0 = vmul.f32 0.6931472, %v808_v63 }
 0x472   : > { %v647_v1 = vsub.f32 %v633_v54, %v645_v0 }
 0x474   : > { %650 = vst.msk [vmem:[%s334_s26 + $0x8] sm:$0xff] %vm648_vm4, %v647_v1 }
 0x475 PF: > { %s19_s30 = sadd.s32 1, %s815_s30  }
 0x476   : > { %p16_p4 = scmp.ge.s32.totalorder %s19_s30, 6  }
 0x478   :  { %18 = sbr.rel (!%p16_p4) target bundleno = 1 (0x1), region = 86 }

</bundles_post_ra>
